<compile_context>
chip_gen: v5e
topology: v5e:2x2
jax: 0.10.0
libtpu: 0.0.40
codegen_flags: <defaults>
</compile_context>

<pallas_src>
import functools

import jax
import jax.numpy as jnp
from jax.experimental import pallas as pl
from jax.experimental.pallas import tpu as pltpu


def _cdiv(a, b):
    return -(-a // b)


def _round_up(n, m):
    return ((n + m - 1) // m) * m


def compnet_kernel(x_ref, w1_ref, b1_ref, w2_ref, b2_ref, o_ref):
    # x:  (TB, E) native dtype (f32 or bf16)   w1: (E, 64) bf16   b1: (1, 64) f32
    # w2: (1, 64) f32                          b2: (1, 1)  f32    o:  (TB, 1) f32
    #
    # In-kernel cast to bf16 (VPU) — avoids a separate mem-bound cast pass over x in HBM.
    x = x_ref[...].astype(jnp.bfloat16)

    # fc1 on the MXU with f32 accumulation.
    h = jnp.dot(x, w1_ref[...], preferred_element_type=jnp.float32)
    h = h + b1_ref[...]

    # LeakyReLU (PyTorch default negative_slope = 0.01), f32 epilogue.
    h = jnp.where(h > 0, h, 0.01 * h)

    # fc2 (64 -> 1): VPU broadcast-multiply + lane reduction instead of an N=1 matmul.
    y = jnp.sum(h * w2_ref[...], axis=-1, keepdims=True) + b2_ref[...]

    # Sigmoid: exp on EUP, approx reciprocal also on EUP (no VALU divide).
    o_ref[...] = pl.reciprocal(1.0 + jnp.exp(-y), approx=True).astype(o_ref.dtype)


@functools.partial(jax.jit, static_argnames=("max_tile",))
def compnet_forward(x, w1, b1, w2, b2, *, max_tile=4096):
    """x: (B, E) f32 or bf16. PyTorch-layout params: w1 (64, E), b1 (64,), w2 (1, 64), b2 (1,)."""
    B, E = x.shape
    H = w1.shape[0]  # 64

    # Batch tile: multiple of 8 (sublane constraint), capped both by max_tile
    # (VMEM: 2 buffers x TB x E x 4 B = 8 MiB at TB=4096/f32, within v5e's 16 MiB default)
    # and by round_up(cdiv(B, 8), 8) so the grid keeps >= ~8 steps (feeds both v7x TCs
    # and keeps the DMA/compute pipeline busy). No padding of B: partial last block is
    # handled by Pallas (OOB rows masked on the output write).
    TB = min(max_tile, _round_up(_cdiv(B, 8), 8))
    TB = max(8, (TB // 8) * 8)
    grid = _cdiv(B, TB)

    # Param prep is tiny (<= 64 KiB) and fuses under jit; MXU weight in bf16, epilogue f32.
    w1_t = w1.T.astype(jnp.bfloat16)                 # (E, H) resident in VMEM
    b1_r = b1.reshape(1, H).astype(jnp.float32)      # (1, H)
    w2_r = w2.reshape(1, H).astype(jnp.float32)      # (1, H)  (row for VPU reduce)
    b2_r = b2.reshape(1, 1).astype(jnp.float32)      # (1, 1)

    out = pl.pallas_call(
        compnet_kernel,
        out_shape=jax.ShapeDtypeStruct((B, 1), jnp.float32),
        grid=(grid,),
        in_specs=[
            pl.BlockSpec((TB, E), lambda i: (i, 0)),   # x: streamed, double-buffered
            pl.BlockSpec((E, H), lambda i: (0, 0)),    # w1: resident
            pl.BlockSpec((1, H), lambda i: (0, 0)),    # b1: resident
            pl.BlockSpec((1, H), lambda i: (0, 0)),    # w2: resident
            pl.BlockSpec((1, 1), lambda i: (0, 0)),    # b2: resident
        ],
        out_specs=pl.BlockSpec((TB, 1), lambda i: (i, 0)),
        compiler_params=pltpu.CompilerParams(
            dimension_semantics=("parallel",),
        ),
    )(x, w1_t, b1_r, w2_r, b2_r)
    return out


def init_params(key, encoding_size=256, hidden=64):
    """Deterministic init mimicking PyTorch nn.Linear default U[-1/sqrt(fan_in), 1/sqrt(fan_in)]."""
    k1, k2, k3, k4 = jax.random.split(key, 4)
    bound1 = 1.0 / (encoding_size ** 0.5)
    bound2 = 1.0 / (hidden ** 0.5)
    w1 = jax.random.uniform(k1, (hidden, encoding_size), jnp.float32, -bound1, bound1)
    b1 = jax.random.uniform(k2, (hidden,), jnp.float32, -bound1, bound1)
    w2 = jax.random.uniform(k3, (1, hidden), jnp.float32, -bound2, bound2)
    b2 = jax.random.uniform(k4, (1,), jnp.float32, -bound2, bound2)
    return w1, b1, w2, b2


if __name__ == "__main__":
    key = jax.random.PRNGKey(0)
    k_x, k_p = jax.random.split(key)

    B, E = 8, 256  # small batch, module's default encoding_size
    x = jax.random.normal(k_x, (B, E), dtype=jnp.float32)
    w1, b1, w2, b2 = init_params(k_p, encoding_size=E, hidden=64)

    out = compnet_forward(x, w1, b1, w2, b2)
    out = jax.block_until_ready(out)

    # Reference in plain JAX, mimicking the kernel's precision (bf16 MXU operands,
    # f32 accumulate/epilogue); sigmoid exact — kernel uses an approx reciprocal.
    x_q = x.astype(jnp.bfloat16).astype(jnp.float32)
    w1_q = w1.astype(jnp.bfloat16).astype(jnp.float32)
    h_ref = x_q @ w1_q.T + b1
    h_ref = jnp.where(h_ref > 0, h_ref, 0.01 * h_ref)
    y_ref = jax.nn.sigmoid(h_ref @ w2.T + b2)

    assert out.shape == (B, 1)
    assert jnp.allclose(out, y_ref, atol=5e-3, rtol=5e-3), (
        f"max abs err {jnp.max(jnp.abs(out - y_ref))}")

    print("KERNEL_OK")
</pallas_src>

<mosaic_0001>
module attributes {stable_mosaic.version = 11 : i64} {
  func.func @compnet_kernel(%arg0: i32, %arg1: memref<8x256xf32, #tpu.memory_space<vmem>>, %arg2: memref<256x64xbf16, #tpu.memory_space<vmem>>, %arg3: memref<1x64xf32, #tpu.memory_space<vmem>>, %arg4: memref<1x64xf32, #tpu.memory_space<vmem>>, %arg5: memref<1x1xf32, #tpu.memory_space<vmem>>, %arg6: memref<8x1xf32, #tpu.memory_space<vmem>>) attributes {dimension_semantics = [#tpu.dimension_semantics<parallel>], iteration_bounds = array<i64: 1>, scalar_prefetch = 0 : i64, scratch_operands = 0 : i64, tpu.core_type = #tpu.core_type<tc>, window_params = [{transform_indices = @transform_0, window_bounds = array<i64: 8, 256>}, {pipeline_mode = #tpu.pipeline_mode<synchronous>, transform_indices = @transform_1, window_bounds = array<i64: 256, 64>}, {pipeline_mode = #tpu.pipeline_mode<synchronous>, transform_indices = @transform_2, window_bounds = array<i64: 1, 64>}, {pipeline_mode = #tpu.pipeline_mode<synchronous>, transform_indices = @transform_3, window_bounds = array<i64: 1, 64>}, {pipeline_mode = #tpu.pipeline_mode<synchronous>, transform_indices = @transform_4, window_bounds = array<i64: 1, 1>}, {transform_indices = @transform_5, window_bounds = array<i64: 8, 1>}]} {
    %c0 = arith.constant 0 : index
    %c0_0 = arith.constant 0 : index
    %0 = vector.load %arg1[%c0, %c0_0] : memref<8x256xf32, #tpu.memory_space<vmem>>, vector<8x256xf32>
    %1 = arith.truncf %0 : vector<8x256xf32> to vector<8x256xbf16>
    %c0_1 = arith.constant 0 : index
    %c0_2 = arith.constant 0 : index
    %2 = vector.load %arg2[%c0_1, %c0_2] : memref<256x64xbf16, #tpu.memory_space<vmem>>, vector<256x64xbf16>
    %cst = arith.constant dense<0.000000e+00> : vector<8x64xf32>
    %3 = tpu.matmul %1, %2, %cst {dimension_numbers = #tpu.dot_dimension_numbers<[1], [0], [0], [1], [0, 0, 1, 1], [], []>} : vector<8x256xbf16>, vector<256x64xbf16>, vector<8x64xf32> -> vector<8x64xf32>
    %c0_3 = arith.constant 0 : index
    %c0_4 = arith.constant 0 : index
    %4 = vector.load %arg3[%c0_3, %c0_4] : memref<1x64xf32, #tpu.memory_space<vmem>>, vector<1x64xf32>
    %5 = vector.broadcast %4 : vector<1x64xf32> to vector<8x64xf32>
    %6 = arith.addf %3, %5 : vector<8x64xf32>
    %cst_5 = arith.constant 0.000000e+00 : f32
    %7 = vector.broadcast %cst_5 : f32 to vector<8x64xf32>
    %8 = arith.cmpf ogt, %6, %7 : vector<8x64xf32>
    %cst_6 = arith.constant 0.00999999977 : f32
    %9 = vector.broadcast %cst_6 : f32 to vector<8x64xf32>
    %10 = arith.mulf %9, %6 : vector<8x64xf32>
    %11 = arith.select %8, %6, %10 : vector<8x64xi1>, vector<8x64xf32>
    %c0_7 = arith.constant 0 : index
    %c0_8 = arith.constant 0 : index
    %12 = vector.load %arg4[%c0_7, %c0_8] : memref<1x64xf32, #tpu.memory_space<vmem>>, vector<1x64xf32>
    %13 = vector.broadcast %12 : vector<1x64xf32> to vector<8x64xf32>
    %14 = arith.mulf %11, %13 : vector<8x64xf32>
    %cst_9 = arith.constant dense<0.000000e+00> : vector<8xf32>
    %15 = vector.multi_reduction <add>, %14, %cst_9 [1] : vector<8x64xf32> to vector<8xf32>
    %16 = vector.shape_cast %15 : vector<8xf32> to vector<8x1xf32>
    %c0_10 = arith.constant 0 : index
    %c0_11 = arith.constant 0 : index
    %17 = vector.load %arg5[%c0_10, %c0_11] : memref<1x1xf32, #tpu.memory_space<vmem>>, vector<1x1xf32>
    %18 = vector.broadcast %17 : vector<1x1xf32> to vector<8x1xf32>
    %19 = arith.addf %16, %18 : vector<8x1xf32>
    %cst_12 = arith.constant 0.000000e+00 : f32
    %20 = vector.broadcast %cst_12 : f32 to vector<8x1xf32>
    %21 = arith.subf %20, %19 : vector<8x1xf32>
    %22 = math.exp %21 : vector<8x1xf32>
    %cst_13 = arith.constant 1.000000e+00 : f32
    %23 = vector.broadcast %cst_13 : f32 to vector<8x1xf32>
    %24 = arith.addf %23, %22 : vector<8x1xf32>
    %25 = tpu.reciprocal %24 {approx = true} : vector<8x1xf32> -> vector<8x1xf32>
    %c0_14 = arith.constant 0 : index
    %c0_15 = arith.constant 0 : index
    %26 = vector.load %arg6[%c0_14, %c0_15] : memref<8x1xf32, #tpu.memory_space<vmem>>, vector<8x1xf32>
    tpu.vector_store %arg6[%c0_14, %c0_15], %25 {strides = array<i32>} : memref<8x1xf32, #tpu.memory_space<vmem>>, vector<8x1xf32>,
    return
  }
  func.func @transform_0(%arg0: i32) -> (i32, i32) {
    %c0_i32 = arith.constant 0 : i32
    %c0_i32_0 = arith.constant 0 : i32
    return %arg0, %c0_i32 : i32, i32
  }
  func.func @transform_1(%arg0: i32) -> (i32, i32) {
    %c0_i32 = arith.constant 0 : i32
    %c0_i32_0 = arith.constant 0 : i32
    %c0_i32_1 = arith.constant 0 : i32
    return %c0_i32, %c0_i32_0 : i32, i32
  }
  func.func @transform_2(%arg0: i32) -> (i32, i32) {
    %c0_i32 = arith.constant 0 : i32
    %c0_i32_0 = arith.constant 0 : i32
    %c0_i32_1 = arith.constant 0 : i32
    return %c0_i32, %c0_i32_0 : i32, i32
  }
  func.func @transform_3(%arg0: i32) -> (i32, i32) {
    %c0_i32 = arith.constant 0 : i32
    %c0_i32_0 = arith.constant 0 : i32
    %c0_i32_1 = arith.constant 0 : i32
    return %c0_i32, %c0_i32_0 : i32, i32
  }
  func.func @transform_4(%arg0: i32) -> (i32, i32) {
    %c0_i32 = arith.constant 0 : i32
    %c0_i32_0 = arith.constant 0 : i32
    %c0_i32_1 = arith.constant 0 : i32
    return %c0_i32, %c0_i32_0 : i32, i32
  }
  func.func @transform_5(%arg0: i32) -> (i32, i32) {
    %c0_i32 = arith.constant 0 : i32
    %c0_i32_0 = arith.constant 0 : i32
    return %arg0, %c0_i32 : i32, i32
  }
}

</mosaic_0001>

<bundles_post_ra>
// kernel: compnet_forward.1
= control target key start
LH: loop header
LB: loop body
LE: loop exit
PB: predicated region body
PF: predicated region fallthrough
CT: control target
= control target key end

     0   :  { %vm192_vm1 = vcmask 523264   ;;  %vm206_vm2 = vcmask 7168   ;;  %s395_s1 = inlined_call_operand.vmem [shape: bf16[256,64], index: 1, kind: input, shape index: {}]   ;;  %s396_s2 = inlined_call_operand.vmem [shape: f32[1,64], index: 2, kind: input, shape index: {}]   ;;  %s397_s0 = inlined_call_operand.vmem [shape: f32[8,256], index: 0, kind: input, shape index: {}]   ;;  %s398_s3 = inlined_call_operand.vmem [shape: f32[1,64], index: 3, kind: input, shape index: {}]   ;;  %s399_s4 = inlined_call_operand.<no memory space> [shape: f32[1,1], index: 4, kind: input, shape index: {}]   ;;  %s400_s5 = inlined_call_operand.vmem [shape: f32[8,1], index: 5, kind: output, shape index: {}]  }
   0x1   :  { %v283_v0 = vld [vmem:[%s395_s1 + $0x38] sm:$0xff]  ;;  %v282_v2 = vld [vmem:[%s395_s1 + $0x30] sm:$0xff]  ;;  %v281_v4 = vld [vmem:[%s395_s1 + $0x28] sm:$0xff]  ;;  %v10_v20 = vstv %s399_s4 }
   0x2   :  { %v291_v1 = vld [vmem:[%s395_s1 + $0x78] sm:$0xff]  ;;  %158 = vmatpush.bf16.msra.mxu0 %v283_v0  ;;  %v290_v3 = vld [vmem:[%s395_s1 + $0x70] sm:$0xff]  ;;  %v289_v5 = vld [vmem:[%s395_s1 + $0x68] sm:$0xff]  ;;  %11 = vst [vmem:[#allocation2] sm:$0x1] %v10_v20 }
   0x3   :  { %171 = vmatpush.bf16.msra.mxu1 %v291_v1  ;;  %v280_v6 = vld [vmem:[%s395_s1 + $0x20] sm:$0xff]  ;;  %v279_v8 = vld [vmem:[%s395_s1 + $0x18] sm:$0xff]  ;;  %v278_v10 = vld [vmem:[%s395_s1 + $0x10] sm:$0xff] }
   0x4   :  { %v288_v7 = vld [vmem:[%s395_s1 + $0x60] sm:$0xff]  ;;  %v287_v9 = vld [vmem:[%s395_s1 + $0x58] sm:$0xff]  ;;  %v286_v11 = vld [vmem:[%s395_s1 + $0x50] sm:$0xff] }
   0x5   :  { %v277_v12 = vld [vmem:[%s395_s1 + $0x8] sm:$0xff]  ;;  %v276_v14 = vld [vmem:[%s395_s1] sm:$0xff] }
   0x6   :  { %159 = vmatpush.bf16.msra.mxu0 %v282_v2  ;;  %v285_v13 = vld [vmem:[%s395_s1 + $0x48] sm:$0xff]  ;;  %v284_v15 = vld [vmem:[%s395_s1 + $0x40] sm:$0xff] }
   0x7   :  { %172 = vmatpush.bf16.msra.mxu1 %v290_v3  ;;  %v22_v16 = vld [vmem:[%s397_s0] sm:$0xff]  ;;  %v23_v17 = vld [vmem:[%s397_s0 + $0x8] sm:$0xff] }
   0x8   :  { %v24_v18 = vpack.c.bf16 %v22_v16, %v22_v16  ;;  %v25_v19 = vpack.c.bf16 %v23_v17, %v23_v17  ;;  %v292_v21 = vld [vmem:[%s396_s2] ss:$0 sm:$0xff] }
   0x9   :  { %v293_v26 = vld [vmem:[%s398_s3] ss:$0 sm:$0xff] }
   0xa   :  { %160 = vmatpush.bf16.msra.mxu0 %v281_v4  ;;  %v294_v33 = vld [vmem:[#allocation2] ss:$0 sm:$0xff] }
   0xb   :  { %173 = vmatpush.bf16.msra.mxu1 %v289_v5 }
   0xe   :  { %161 = vmatpush.bf16.msra.mxu0 %v280_v6 }
   0xf   :  { %174 = vmatpush.bf16.msra.mxu1 %v288_v7 }
  0x12   :  { %162 = vmatpush.bf16.msra.mxu0 %v279_v8 }
  0x13   :  { %175 = vmatpush.bf16.msra.mxu1 %v287_v9 }
  0x16   :  { %163 = vmatpush.bf16.msra.mxu0 %v278_v10 }
  0x17   :  { %176 = vmatpush.bf16.msra.mxu1 %v286_v11 }
  0x1a   :  { %164 = vmatpush.bf16.msra.mxu0 %v277_v12 }
  0x1b   :  { %177 = vmatpush.bf16.msra.mxu1 %v285_v13 }
  0x1e   :  { %165 = vmatpush.bf16.msra.mxu0 %v276_v14 }
  0x1f   :  { %178 = vmatpush.bf16.msra.mxu1 %v284_v15 }
  0x21   :  { %166 = vmatmul.bf16.vlgmr.msra.gmra.mxu0 %v24_v18 }
  0x22   :  { %179 = vmatmul.bf16.vlgmr.msra.gmra.mxu1 %v25_v19 }
  0x9e   :  { %v167_v22 = vpop.f32.mrf.mxu0 }
  0x9f   :  { %v180_v23 = vpop.f32.mrf.mxu1  ;;  %v168_v24 = vadd.f32 %v292_v21, %v167_v22 }
  0xa1   :  { %v181_v25 = vadd.f32 %v180_v23, %v168_v24 }
  0xa3   :  { %v185_v27 = vmul.f32 0.01, %v181_v25  ;;  %vm184_vm0 = vcmp.gt.f32.partialorder %v181_v25, 0.0 }
  0xa5   :  { %v186_v28 = vsel %vm184_vm0, %v181_v25, %v185_v27 }
  0xa6   :  { %v169_v29 = vpop.f32.mrf.mxu0  ;;  %v191_v31 = vmul.f32 %v293_v26, %v186_v28 }
  0xa7   :  { %v182_v30 = vpop.f32.mrf.mxu1 }
  0xa8   :  { %v193_v32 = vsel %vm192_vm1, %v191_v31, 0.0 }
  0xa9   :  { %194 = vadd.xlane.f32.xlu0 %v193_v32 }
 0x11c   :  { %v195_v34 = vpop.xlane.xlu0 %194 }
 0x11d   :  { %v200_v35 = vadd.f32 %v294_v33, %v195_v34 }
 0x11f   :  { %v201_v36 = vsub.f32 0.0, %v200_v35 }
 0x121   :  { %v202_v37 = vmul.f32 1.442695, %v201_v36 }
 0x123   :  { %295 = vpow2.f32 %v202_v37 }
 0x129   :  { %v296_v38 = vpop.eup %295 }
 0x12a   :  { %v204_v39 = vadd.f32 1.0, %v296_v38 }
 0x12c   :  { %297 = vrcp.f32 %v204_v39 }
 0x132   :  { %v298_v40 = vpop.eup %297 }
 0x133   :  { %207 = vst.msk [vmem:[%s400_s5] sm:$0xff] %vm206_vm2, %v298_v40 }

</bundles_post_ra>
